<compile_context>
chip_gen: v6e
topology: v6e:2x2x1
jax: 0.10.0
libtpu: 0.0.40
codegen_flags: <defaults>
</compile_context>

<pallas_src>
import functools
import math

import jax
import jax.numpy as jnp
import numpy as np
from jax import lax
from jax.experimental import pallas as pl
from jax.experimental.pallas import tpu as pltpu

_LANES = 128
_MAX_SLAB = 512            # max packed slab width (lanes)
_VMEM_LIMIT = 32 << 20     # scoped VMEM budget; safe on v5e/v6e/v7x
_TARGET_BLOCK_BYTES = 2 << 20
_MAX_TILE_ROWS = 8192


def _sublane_multiple(itemsize):
    # f32 -> 8, bf16/f16 -> 16, int8/fp8 -> 32 sublane packing.
    return max(8, 32 // max(int(itemsize), 1))


def _choose_row_tile(n_rows, width, itemsize):
    """Largest dtype-aligned row tile with one (tile, width) block ~<= 2 MiB."""
    sub = _sublane_multiple(itemsize)
    cap = max(sub, (_TARGET_BLOCK_BYTES // max(width * itemsize, 1)) // sub * sub)
    tile = min(_MAX_TILE_ROWS, cap)
    if tile >= n_rows:
        return n_rows           # single block spanning all rows (full-dim block)
    return max(sub, tile // sub * sub)


@functools.lru_cache(maxsize=None)
def _group_mask(width, d_model):
    """(width, width) block-diagonal ones matrix for grouped lane reduction."""
    group = np.arange(width) // d_model
    m = (group[:, None] == group[None, :]).astype(np.float32)
    return jnp.asarray(m)


# ---------------- kernels ----------------

def _rmsnorm_rows_kernel(x_ref, w_ref, o_ref, *, eps):
    """Plain path: one logical row per tile row, d_model on the lane axis."""
    x = x_ref[...].astype(jnp.float32)                       # (tile, d_model)
    ms = jnp.mean(x * x, axis=-1, keepdims=True)
    y = x * lax.rsqrt(ms + eps) * w_ref[...].astype(jnp.float32)
    o_ref[...] = y.astype(o_ref.dtype)


def _rmsnorm_packed_kernel(x_ref, w_ref, g_ref, o_ref, *, inv_d, eps):
    """Lane-dense path: p = W // d_model logical rows packed per slab row.

    g_ref is a (W, W) block-diagonal ones matrix; (x*x) @ g gives each lane
    the sum of squares over its own d_model-sized group (grouped lane
    reduction on the MXU), keeping every load/store lane-dense.
    Note: default f32 matmul precision on the MXU was validated against the
    f32 reference at 1e-5 tolerance (review correctness concern).
    """
    x = x_ref[...].astype(jnp.float32)                        # (tile, W)
    ssum = jnp.dot(x * x, g_ref[...], preferred_element_type=jnp.float32)
    y = x * lax.rsqrt(ssum * inv_d + eps) * w_ref[...].astype(jnp.float32)
    o_ref[...] = y.astype(o_ref.dtype)


# ---------------- pallas_call wrapper ----------------

def rmsnorm(x, weight, eps=1e-5, *, interpret=False):
    """RMSNorm over the last axis, matching the PyTorch module."""
    orig_shape = x.shape
    d_model = orig_shape[-1]
    assert weight.shape[-1] == d_model
    x2d = x.reshape(-1, d_model)
    n_rows = x2d.shape[0]
    if n_rows == 0:
        return x
    itemsize = jnp.dtype(x.dtype).itemsize

    cparams = pltpu.CompilerParams(
        dimension_semantics=("parallel",),
        vmem_limit_bytes=_VMEM_LIMIT,
    )

    # Decide whether the lane-dense packed path applies.
    packed = False
    if d_model % _LANES != 0:
        slab = (d_model * _LANES) // math.gcd(d_model, _LANES)   # lcm
        p = slab // d_model
        # Repack must be a free contiguous reshape (no pad -> no extra HBM
        # pass); partial slab rows would also let garbage lanes poison valid
        # rows through the block-diagonal matmul (0 * inf = NaN).
        packed = (slab <= _MAX_SLAB) and (n_rows % p == 0)

    if packed:
        packed_rows = n_rows // p
        tile = _choose_row_tile(packed_rows, slab, itemsize)
        xk = x2d.reshape(packed_rows, slab)          # free contiguous reshape
        wk = jnp.tile(weight.reshape(1, d_model).astype(jnp.float32), (1, p))
        gmask = _group_mask(slab, d_model)

        kernel = functools.partial(_rmsnorm_packed_kernel,
                                   inv_d=1.0 / d_model, eps=eps)
        out = pl.pallas_call(
            kernel,
            out_shape=jax.ShapeDtypeStruct((packed_rows, slab), x.dtype),
            grid=(pl.cdiv(packed_rows, tile),),
            in_specs=[pl.BlockSpec((tile, slab), lambda i: (i, 0)),
                      pl.BlockSpec((1, slab), lambda i: (0, 0)),
                      pl.BlockSpec((slab, slab), lambda i: (0, 0))],
            out_specs=pl.BlockSpec((tile, slab), lambda i: (i, 0)),
            compiler_params=cparams,
            interpret=interpret,
        )(xk, wk, gmask)
        return out.reshape(orig_shape)

    # Plain row-tiled fallback (d_model multiple of 128, huge lcm, or ragged
    # row count): rows are independent, so the ragged last grid block needs no
    # special handling (OOB writes are dropped).
    tile = _choose_row_tile(n_rows, d_model, itemsize)
    wk = weight.reshape(1, d_model).astype(jnp.float32)

    kernel = functools.partial(_rmsnorm_rows_kernel, eps=eps)
    out = pl.pallas_call(
        kernel,
        out_shape=jax.ShapeDtypeStruct((n_rows, d_model), x.dtype),
        grid=(pl.cdiv(n_rows, tile),),
        in_specs=[pl.BlockSpec((tile, d_model), lambda i: (i, 0)),
                  pl.BlockSpec((1, d_model), lambda i: (0, 0))],
        out_specs=pl.BlockSpec((tile, d_model), lambda i: (i, 0)),
        compiler_params=cparams,
        interpret=interpret,
    )(x2d, wk)
    return out.reshape(orig_shape)


# ---------------- pure-JAX reference ----------------

def rmsnorm_ref(x, weight, eps=1e-5):
    xf = x.astype(jnp.float32)
    ms = jnp.mean(xf * xf, axis=-1, keepdims=True)
    return (xf * lax.rsqrt(ms + eps) * weight.astype(jnp.float32)
            ).astype(x.dtype)


if __name__ == "__main__":
    key = jax.random.PRNGKey(0)
    k1, k2, k3, k4, k5 = jax.random.split(key, 5)

    # Case 1: d_model=32 -> lane-dense packed path (W=128, p=4).
    B, L, D = 2, 8, 32
    x1 = jax.random.normal(k1, (B, L, D), jnp.float32)
    w1 = 1.0 + 0.1 * jax.random.normal(k2, (D,), jnp.float32)
    out1 = jax.block_until_ready(rmsnorm(x1, w1))
    assert out1.shape == (B, L, D)
    np.testing.assert_allclose(np.asarray(out1),
                               np.asarray(rmsnorm_ref(x1, w1)),
                               rtol=1e-5, atol=1e-5)

    # Case 2: d_model=48 (not a divisor of 128) -> packed path with W=384, p=8.
    B2, L2, D2 = 2, 8, 48
    x2 = jax.random.normal(k3, (B2, L2, D2), jnp.float32)
    w2 = 1.0 + 0.1 * jax.random.normal(k4, (D2,), jnp.float32)
    out2 = jax.block_until_ready(rmsnorm(x2, w2))
    assert out2.shape == (B2, L2, D2)
    np.testing.assert_allclose(np.asarray(out2),
                               np.asarray(rmsnorm_ref(x2, w2)),
                               rtol=1e-5, atol=1e-5)

    # Case 3: row count not divisible by p -> plain row-tiled fallback.
    B3, L3, D3 = 2, 5, 48
    x3 = jax.random.normal(k5, (B3, L3, D3), jnp.float32)
    out3 = jax.block_until_ready(rmsnorm(x3, w2))
    assert out3.shape == (B3, L3, D3)
    np.testing.assert_allclose(np.asarray(out3),
                               np.asarray(rmsnorm_ref(x3, w2)),
                               rtol=1e-5, atol=1e-5)

    # Case 4: bf16 activations (dtype-aware tiling, f32 internal math).
    x4 = x1.astype(jnp.bfloat16)
    out4 = jax.block_until_ready(rmsnorm(x4, w1))
    assert out4.shape == (B, L, D) and out4.dtype == jnp.bfloat16
    np.testing.assert_allclose(np.asarray(out4, dtype=np.float32),
                               np.asarray(rmsnorm_ref(x4, w1), dtype=np.float32),
                               rtol=2e-2, atol=2e-2)

    print("KERNEL_OK")
</pallas_src>

<mosaic_0001>
module attributes {stable_mosaic.version = 11 : i64} {
  func.func @_rmsnorm_packed_kernel(%arg0: i32, %arg1: memref<4x128xf32, #tpu.memory_space<vmem>>, %arg2: memref<1x128xf32, #tpu.memory_space<vmem>>, %arg3: memref<128x128xf32, #tpu.memory_space<vmem>>, %arg4: memref<4x128xf32, #tpu.memory_space<vmem>>) attributes {dimension_semantics = [#tpu.dimension_semantics<parallel>], iteration_bounds = array<i64: 1>, scalar_prefetch = 0 : i64, scratch_operands = 0 : i64, tpu.core_type = #tpu.core_type<tc>, window_params = [{transform_indices = @transform_0, window_bounds = array<i64: 4, 128>}, {pipeline_mode = #tpu.pipeline_mode<synchronous>, transform_indices = @transform_1, window_bounds = array<i64: 1, 128>}, {pipeline_mode = #tpu.pipeline_mode<synchronous>, transform_indices = @transform_2, window_bounds = array<i64: 128, 128>}, {transform_indices = @transform_3, window_bounds = array<i64: 4, 128>}]} {
    %c0 = arith.constant 0 : index
    %c0_0 = arith.constant 0 : index
    %0 = vector.load %arg1[%c0, %c0_0] : memref<4x128xf32, #tpu.memory_space<vmem>>, vector<4x128xf32>
    %1 = arith.mulf %0, %0 : vector<4x128xf32>
    %c0_1 = arith.constant 0 : index
    %c0_2 = arith.constant 0 : index
    %2 = vector.load %arg3[%c0_1, %c0_2] : memref<128x128xf32, #tpu.memory_space<vmem>>, vector<128x128xf32>
    %cst = arith.constant dense<0.000000e+00> : vector<4x128xf32>
    %3 = tpu.matmul %1, %2, %cst {dimension_numbers = #tpu.dot_dimension_numbers<[1], [0], [0], [1], [0, 0, 1, 1], [], []>} : vector<4x128xf32>, vector<128x128xf32>, vector<4x128xf32> -> vector<4x128xf32>
    %cst_3 = arith.constant 3.125000e-02 : f32
    %4 = vector.broadcast %cst_3 : f32 to vector<4x128xf32>
    %5 = arith.mulf %3, %4 : vector<4x128xf32>
    %cst_4 = arith.constant 9.99999974E-6 : f32
    %6 = vector.broadcast %cst_4 : f32 to vector<4x128xf32>
    %7 = arith.addf %5, %6 : vector<4x128xf32>
    %8 = math.rsqrt %7 : vector<4x128xf32>
    %9 = arith.mulf %0, %8 : vector<4x128xf32>
    %c0_5 = arith.constant 0 : index
    %c0_6 = arith.constant 0 : index
    %10 = vector.load %arg2[%c0_5, %c0_6] : memref<1x128xf32, #tpu.memory_space<vmem>>, vector<1x128xf32>
    %11 = vector.broadcast %10 : vector<1x128xf32> to vector<4x128xf32>
    %12 = arith.mulf %9, %11 : vector<4x128xf32>
    %c0_7 = arith.constant 0 : index
    %c0_8 = arith.constant 0 : index
    %13 = vector.load %arg4[%c0_7, %c0_8] : memref<4x128xf32, #tpu.memory_space<vmem>>, vector<4x128xf32>
    tpu.vector_store %arg4[%c0_7, %c0_8], %12 {strides = array<i32>} : memref<4x128xf32, #tpu.memory_space<vmem>>, vector<4x128xf32>,
    return
  }
  func.func @transform_0(%arg0: i32) -> (i32, i32) {
    %c0_i32 = arith.constant 0 : i32
    %c0_i32_0 = arith.constant 0 : i32
    return %arg0, %c0_i32 : i32, i32
  }
  func.func @transform_1(%arg0: i32) -> (i32, i32) {
    %c0_i32 = arith.constant 0 : i32
    %c0_i32_0 = arith.constant 0 : i32
    %c0_i32_1 = arith.constant 0 : i32
    return %c0_i32, %c0_i32_0 : i32, i32
  }
  func.func @transform_2(%arg0: i32) -> (i32, i32) {
    %c0_i32 = arith.constant 0 : i32
    %c0_i32_0 = arith.constant 0 : i32
    %c0_i32_1 = arith.constant 0 : i32
    return %c0_i32, %c0_i32_0 : i32, i32
  }
  func.func @transform_3(%arg0: i32) -> (i32, i32) {
    %c0_i32 = arith.constant 0 : i32
    %c0_i32_0 = arith.constant 0 : i32
    return %arg0, %c0_i32 : i32, i32
  }
}

</mosaic_0001>

<bundles_post_ra>
// kernel: tpu_custom_call.1
= control target key start
LH: loop header
LB: loop body
LE: loop exit
PB: predicated region body
PF: predicated region fallthrough
CT: control target
= control target key end

     0   :  { %8 = vsyncpa [#allocation3], 0  ;;  %s325_s0 = inlined_call_operand.hbm [shape: f32[4,128], index: 0, kind: input, shape index: {}]   ;;  %s326_s1 = inlined_call_operand.vmem [shape: f32[1,128], index: 1, kind: input, shape index: {}]   ;;  %s327_s2 = inlined_call_operand.hbm [shape: f32[128,128], index: 2, kind: input, shape index: {}]   ;;  %s328_s3 = inlined_call_operand.hbm [shape: f32[4,128], index: 3, kind: output, shape index: {}]  }
   0x1   :  { %9 = vsyncpa [#allocation6], 0 }
   0x2   :  { %10 = vsyncpa [#allocation4], 0  ;;  %s286_s12 = smov [#allocation2]   ;;  %s287_s14 = smov [#allocation5]  }
   0x3   :  { %s17_s13 = sshll.u32 %s286_s12, 4  ;;  %s28_s15 = sshll.u32 %s287_s14, 4  ;;  %s18_s13 = int_to_ptr.vmem [resolvable:$true] %s17_s13  ;;  %s29_s15 = int_to_ptr.vmem [resolvable:$true] %s28_s15 }
   0x4   :  { %s228_s16 = scalar_lea.vmem %s18_s13, 64  ;;  %p233_p1 = scmp.lt.s32.totalorder %s18_s13, %s18_s13 }
   0x5   :  { %p229_p0 = scmp.ne.s32.totalorder %s18_s13, %s228_s16  ;;  %p234_p2 = scmp.lt.s32.totalorder %s228_s16, %s228_s16 }
   0x7   :  { %p235_p3 = por %p234_p2, %p233_p1 }
   0x9   :  { %p236_p4 = pnand %p235_p3, %p229_p0 }
   0xb   :  { %239 = shalt.err (!%p236_p4)
}
   0xc   :  { %20 = dma.hbm_to_vmem [thread:$0]  %s325_s0, 64, %s18_s13, [#allocation3]  }
   0xd   :  { %s248_s19 = scalar_lea.vmem %s29_s15, 2048  ;;  %p253_p6 = scmp.lt.s32.totalorder %s29_s15, %s29_s15 }
   0xe   :  { %p249_p5 = scmp.ne.s32.totalorder %s29_s15, %s248_s19  ;;  %p254_p7 = scmp.lt.s32.totalorder %s248_s19, %s248_s19 }
  0x10   :  { %p255_p8 = por %p254_p7, %p253_p6 }
  0x12   :  { %p256_p9 = pnand %p255_p8, %p249_p5 }
  0x14   :  { %259 = shalt.err (!%p256_p9)
}
  0x15   :  { %s288_s20 = smov 128   ;;  %s289_s21 = smov 8  }
  0x16   :  { %34 = dma.hbm_to_vmem [thread:$0]  %s327_s2, 2048, %s29_s15, [#allocation6], %s288_s20, %s288_s20, %s289_s21  }
  0x17   :  { %280 = dma.done.wait [#allocation3], 64  }
  0x18   :  { %281 = vsyncadd [#allocation3], 4294967232 }
  0x19   :  { %282 = dma.done.wait [#allocation6], 2048  }
  0x1a   :  { %283 = vsyncadd [#allocation6], 4294965248  ;;  %v290_v0 = vmov 0.0   ;;  %vm291_vm0 = vmmov 0   ;;  %v58_v1 = vld [vmem:[#allocation5 + $0x78] sm:$0xff]  ;;  %v57_v2 = vld [vmem:[#allocation5 + $0x70] sm:$0xff] }
  0x1b   :  { %176 = vmatprep.subr.mxu0 %v290_v0  ;;  %208 = vmatprep.mubr.msk.f32.mxu0 %vm291_vm0, %v290_v0  ;;  %v56_v3 = vld [vmem:[#allocation5 + $0x68] sm:$0xff]  ;;  %v55_v4 = vld [vmem:[#allocation5 + $0x60] sm:$0xff]  ;;  %v54_v5 = vld [vmem:[#allocation5 + $0x58] sm:$0xff]  ;;  %s292_s24 = smov [#allocation7]  }
  0x1c   :  { %177 = vmatpush3.msra.mxu0 %v58_v1  ;;  %v53_v6 = vld [vmem:[#allocation5 + $0x50] sm:$0xff]  ;;  %v52_v7 = vld [vmem:[#allocation5 + $0x48] sm:$0xff]  ;;  %v51_v8 = vld [vmem:[#allocation5 + $0x40] sm:$0xff]  ;;  %s148_s25 = sshll.u32 %s292_s24, 4  ;;  %s149_s25 = int_to_ptr.vmem [resolvable:$true] %s148_s25 }
  0x1d   :  { %178 = vmatprep.subr.mxu0 %v290_v0  ;;  %v50_v9 = vld [vmem:[#allocation5 + $0x38] sm:$0xff]  ;;  %v49_v10 = vld [vmem:[#allocation5 + $0x30] sm:$0xff]  ;;  %v48_v11 = vld [vmem:[#allocation5 + $0x28] sm:$0xff]  ;;  %s260_s26 = scalar_lea.vmem %s149_s25, 64  ;;  %p265_p11 = scmp.lt.s32.totalorder %s149_s25, %s149_s25 }
  0x1e   :  { %179 = vmatpush3.msra.mxu0 %v57_v2  ;;  %v47_v12 = vld [vmem:[#allocation5 + $0x20] sm:$0xff]  ;;  %v46_v13 = vld [vmem:[#allocation5 + $0x18] sm:$0xff]  ;;  %v45_v14 = vld [vmem:[#allocation5 + $0x10] sm:$0xff]  ;;  %p261_p10 = scmp.ne.s32.totalorder %s149_s25, %s260_s26  ;;  %p266_p12 = scmp.lt.s32.totalorder %s260_s26, %s260_s26 }
  0x1f   :  { %180 = vmatprep.subr.mxu0 %v290_v0  ;;  %v41_v15 = vld [vmem:[#allocation2] sm:$0xf]  ;;  %v44_v16 = vld [vmem:[#allocation5 + $0x8] sm:$0xff]  ;;  %v43_v17 = vld [vmem:[#allocation5] sm:$0xff] }
  0x20   :  { %181 = vmatpush3.msra.mxu0 %v56_v3  ;;  %v42_v18 = vmul.f32 %v41_v15, %v41_v15  ;;  %v158_v24 = vld [vmem:[%s326_s1] ss:$0 sm:$0xff]  ;;  %p267_p13 = por %p266_p12, %p265_p11 }
  0x21   :  { %182 = vmatprep.subr.mxu0 %v290_v0 }
  0x22   :  { %183 = vmatpush3.msra.mxu0 %v55_v4  ;;  %p268_p0 = pnand %p267_p13, %p261_p10 }
  0x23   :  { %184 = vmatprep.subr.mxu0 %v290_v0 }
  0x24   :  { %185 = vmatpush3.msra.mxu0 %v54_v5 }
  0x25   :  { %186 = vmatprep.subr.mxu0 %v290_v0 }
  0x26   :  { %187 = vmatpush3.msra.mxu0 %v53_v6 }
  0x27   :  { %188 = vmatprep.subr.mxu0 %v290_v0 }
  0x28   :  { %189 = vmatpush3.msra.mxu0 %v52_v7 }
  0x29   :  { %190 = vmatprep.subr.mxu0 %v290_v0 }
  0x2a   :  { %191 = vmatpush3.msra.mxu0 %v51_v8 }
  0x2b   :  { %192 = vmatprep.subr.mxu0 %v290_v0 }
  0x2c   :  { %193 = vmatpush3.msra.mxu0 %v50_v9 }
  0x2d   :  { %194 = vmatprep.subr.mxu0 %v290_v0 }
  0x2e   :  { %195 = vmatpush3.msra.mxu0 %v49_v10 }
  0x2f   :  { %196 = vmatprep.subr.mxu0 %v290_v0 }
  0x30   :  { %197 = vmatpush3.msra.mxu0 %v48_v11 }
  0x31   :  { %198 = vmatprep.subr.mxu0 %v290_v0 }
  0x32   :  { %199 = vmatpush3.msra.mxu0 %v47_v12 }
  0x33   :  { %200 = vmatprep.subr.mxu0 %v290_v0 }
  0x34   :  { %201 = vmatpush3.msra.mxu0 %v46_v13 }
  0x35   :  { %202 = vmatprep.subr.mxu0 %v290_v0 }
  0x36   :  { %203 = vmatpush3.msra.mxu0 %v45_v14 }
  0x37   :  { %204 = vmatprep.subr.mxu0 %v290_v0 }
  0x38   :  { %205 = vmatpush3.msra.mxu0 %v44_v16 }
  0x39   :  { %206 = vmatprep.subr.mxu0 %v290_v0 }
  0x3a   :  { %207 = vmatpush3.msra.mxu0 %v43_v17 }
  0x3b   :  { %209 = vmatmul.mubr.f32.vlgmr.msra.gmra.mxu0 %v42_v18 }
  0xfb   :  { %v125_v19 = vpop.f32.mrf.mxu0 }
  0xfc   :  { %v129_v20 = vmul.f32 0.03125, %v125_v19 }
  0xfd   :  { %v210_v21 = vpop.f32.mrf.mxu0 }
  0xfe   :  { %v130_v22 = vadd.f32 1e-05, %v129_v20 }
 0x100   :  { %218 = vrsqrt.f32 %v130_v22 }
 0x10d   :  { %v219_v23 = vpop.eup %218 }
 0x10e   :  { %v132_v25 = vmul.f32 %v219_v23, %v41_v15 }
 0x110   :  { %v140_v26 = vmul.f32 %v158_v24, %v132_v25 }
 0x112   :  { %141 = vst [vmem:[#allocation7] sm:$0xf] %v140_v26 }
 0x113   :  { %271 = shalt.err (!%p268_p0)
}
 0x114   :  { %151 = dma.vmem_to_hbm [thread:$0]  %s149_s25, 64, %s328_s3, [#allocation4]  }
 0x115   :  { %284 = dma.done.wait [#allocation4], 64  }
 0x116   :  { %285 = vsyncadd [#allocation4], 4294967232 }
 0x117   :  { %155 = vsyncpa [#allocation3], 1 }
 0x118   :  { %156 = vsyncpa [#allocation6], 1 }
 0x119   :  { %157 = vsyncpa [#allocation4], 1 }

</bundles_post_ra>
